<compile_context>
chip_gen: v7x
topology: tpu7x:2x2x1
jax: 0.10.0
libtpu: 0.0.40
codegen_flags: <defaults>
</compile_context>

<pallas_src>
import math

import jax
import jax.numpy as jnp
from jax import lax
from jax.experimental import pallas as pl
from jax.experimental.pallas import tpu as pltpu


# ----------------------------------------------------------------------------
# Fused LSTM-encoder kernel factory (num_layers / shapes are Python constants).
# ----------------------------------------------------------------------------
def _make_lstm_encoder_kernel(num_layers, T, B_pad, H):
    def kernel(*refs):
        # refs layout:
        #   x_ref (T*B_pad, D),
        #   per layer l: w_ih_l (D_l, 4H), w_hh_l (H, 4H), b_l (1, 4H),
        #   fc_w (H, O), fc_b (1, O),
        #   out (B_pad, O),
        #   scratches: gi (T*B_pad, 4H), seq (T*B_pad, H), h (B_pad, H), c (B_pad, H)
        x_ref = refs[0]
        w_refs = refs[1:1 + 3 * num_layers]
        fc_w_ref = refs[1 + 3 * num_layers]
        fc_b_ref = refs[2 + 3 * num_layers]
        out_ref = refs[3 + 3 * num_layers]
        gi_ref, seq_ref, h_ref, c_ref = refs[4 + 3 * num_layers:]

        for layer in range(num_layers):
            w_ih_ref = w_refs[3 * layer + 0]
            w_hh_ref = w_refs[3 * layer + 1]
            b_ref = w_refs[3 * layer + 2]

            # ---- hoisted input projection: one big matmul per layer,
            # bias (b_ih + b_hh) pre-folded so the time loop has no bias adds.
            src_ref = x_ref if layer == 0 else seq_ref
            gi_ref[...] = (
                jnp.dot(src_ref[...], w_ih_ref[...],
                        preferred_element_type=jnp.float32)
                + b_ref[...])

            # ---- recurrence: VMEM-resident state, no grid-step overhead.
            h_ref[...] = jnp.zeros_like(h_ref)
            c_ref[...] = jnp.zeros_like(c_ref)
            w_hh = w_hh_ref[...]                  # loop-invariant, hoisted load
            is_last = (layer == num_layers - 1)

            @pl.loop(0, T)
            def _(t):
                row = pl.multiple_of(t * B_pad, B_pad)      # sublane-aligned
                gi = gi_ref[pl.ds(row, B_pad), :]           # (B_pad, 4H)
                h_prev = h_ref[...]
                c_prev = c_ref[...]
                gates = gi + jnp.dot(h_prev, w_hh,
                                     preferred_element_type=jnp.float32)
                # PyTorch LSTM gate order: input, forget, cell(g), output.
                i_g = jax.nn.sigmoid(gates[:, 0 * H:1 * H])
                f_g = jax.nn.sigmoid(gates[:, 1 * H:2 * H])
                g_g = jnp.tanh(gates[:, 2 * H:3 * H])
                o_g = jax.nn.sigmoid(gates[:, 3 * H:4 * H])
                c_new = f_g * c_prev + i_g * g_g
                h_new = o_g * jnp.tanh(c_new)
                h_ref[...] = h_new
                c_ref[...] = c_new
                if not is_last:
                    # Keep intermediate sequence in VMEM for the next layer's
                    # hoisted projection (never round-trips through HBM).
                    seq_ref[pl.ds(row, B_pad), :] = h_new

        # ---- fused final Linear on the resident last hidden state
        # (== out[:, -1, :] of the batch-first LSTM output).
        out_ref[...] = (
            jnp.dot(h_ref[...], fc_w_ref[...],
                    preferred_element_type=jnp.float32)
            + fc_b_ref[...]).astype(out_ref.dtype)

    return kernel


# ----------------------------------------------------------------------------
# Wrapper: layout glue in plain JAX, all compute in one pallas_call.
# ----------------------------------------------------------------------------
def lstm_encoder_forward(x, params):
    """x: (batch, seq_len, input_size), batch-first like the PyTorch module."""
    B, T, D = x.shape
    H = params["hidden_dim"]
    O = params["fc_w"].shape[1]
    num_layers = len(params["layers"])
    B_pad = ((B + 7) // 8) * 8            # pad batch to a sublane multiple

    # batch-first -> time-major, pad batch, flatten to (T*B_pad, D).
    x_tm = jnp.transpose(x.astype(jnp.float32), (1, 0, 2))      # (T, B, D)
    x_tm = jnp.pad(x_tm, ((0, 0), (0, B_pad - B), (0, 0)))
    x2d = x_tm.reshape(T * B_pad, D)

    inputs = [x2d]
    for p in params["layers"]:
        inputs += [p["w_ih"], p["w_hh"], p["b_ih"] + p["b_hh"]]  # fold biases
    inputs += [params["fc_w"], params["fc_b"]]

    kernel = _make_lstm_encoder_kernel(num_layers, T, B_pad, H)

    out_pad = pl.pallas_call(
        kernel,
        out_shape=jax.ShapeDtypeStruct((B_pad, O), jnp.float32),
        scratch_shapes=[
            pltpu.VMEM((T * B_pad, 4 * H), jnp.float32),   # hoisted gate projection
            pltpu.VMEM((T * B_pad, H), jnp.float32),       # inter-layer sequence
            pltpu.VMEM((B_pad, H), jnp.float32),           # h state
            pltpu.VMEM((B_pad, H), jnp.float32),           # c state
        ],
    )(*inputs)
    return out_pad[:B]


# ----------------------------------------------------------------------------
# Parameter init (PyTorch-style uniform(-1/sqrt(H), 1/sqrt(H)), weights stored
# transposed so the kernel does x @ W directly).
# ----------------------------------------------------------------------------
def init_params(key, input_size, hidden_dim, num_layers, output_dim):
    scale = 1.0 / math.sqrt(hidden_dim)
    params = {"hidden_dim": hidden_dim, "layers": []}

    def uni(k, shape, s):
        return jax.random.uniform(k, shape, jnp.float32, -s, s)

    for layer in range(num_layers):
        d_in = input_size if layer == 0 else hidden_dim
        key, k1, k2, k3, k4 = jax.random.split(key, 5)
        params["layers"].append({
            "w_ih": uni(k1, (d_in, 4 * hidden_dim), scale),
            "w_hh": uni(k2, (hidden_dim, 4 * hidden_dim), scale),
            "b_ih": uni(k3, (1, 4 * hidden_dim), scale),
            "b_hh": uni(k4, (1, 4 * hidden_dim), scale),
        })

    key, k1, k2 = jax.random.split(key, 3)
    fc_scale = 1.0 / math.sqrt(hidden_dim)
    params["fc_w"] = uni(k1, (hidden_dim, output_dim), fc_scale)
    params["fc_b"] = uni(k2, (1, output_dim), fc_scale)
    return params


# ----------------------------------------------------------------------------
# Pure-JAX reference (for correctness check).
# ----------------------------------------------------------------------------
def lstm_encoder_reference(x, params):
    B, T, D = x.shape
    H = params["hidden_dim"]
    seq = jnp.transpose(x.astype(jnp.float32), (1, 0, 2))       # (T, B, D)
    h_last = None
    for p in params["layers"]:
        def step(carry, x_t, p=p):
            h, c = carry
            gates = (x_t @ p["w_ih"] + p["b_ih"]
                     + h @ p["w_hh"] + p["b_hh"])
            i = jax.nn.sigmoid(gates[:, 0 * H:1 * H])
            f = jax.nn.sigmoid(gates[:, 1 * H:2 * H])
            g = jnp.tanh(gates[:, 2 * H:3 * H])
            o = jax.nn.sigmoid(gates[:, 3 * H:4 * H])
            c_new = f * c + i * g
            h_new = o * jnp.tanh(c_new)
            return (h_new, c_new), h_new

        h0 = jnp.zeros((B, H), jnp.float32)
        c0 = jnp.zeros((B, H), jnp.float32)
        (h_last, _), seq = lax.scan(step, (h0, c0), seq)
    return h_last @ params["fc_w"] + params["fc_b"]


if __name__ == "__main__":
    # Small shapes consistent with the module: x is (batch, seq_len, input_size).
    batch, seq_len, input_size = 2, 8, 16
    hidden_dim, num_layers, output_dim = 32, 2, 16

    key = jax.random.PRNGKey(0)
    kx, kp = jax.random.split(key)
    x = jax.random.normal(kx, (batch, seq_len, input_size), jnp.float32)
    params = init_params(kp, input_size, hidden_dim, num_layers, output_dim)

    out = lstm_encoder_forward(x, params)
    out = jax.block_until_ready(out)

    ref = lstm_encoder_reference(x, params)
    assert out.shape == (batch, output_dim)
    assert jnp.allclose(out, ref, atol=1e-4, rtol=1e-4), "mismatch vs reference"

    print("KERNEL_OK")
</pallas_src>

<mosaic_0001>
module attributes {stable_mosaic.version = 11 : i64} {
  func.func @kernel(%arg0: memref<64x16xf32, #tpu.memory_space<vmem>>, %arg1: memref<16x128xf32, #tpu.memory_space<vmem>>, %arg2: memref<32x128xf32, #tpu.memory_space<vmem>>, %arg3: memref<1x128xf32, #tpu.memory_space<vmem>>, %arg4: memref<32x128xf32, #tpu.memory_space<vmem>>, %arg5: memref<32x128xf32, #tpu.memory_space<vmem>>, %arg6: memref<1x128xf32, #tpu.memory_space<vmem>>, %arg7: memref<32x16xf32, #tpu.memory_space<vmem>>, %arg8: memref<1x16xf32, #tpu.memory_space<vmem>>, %arg9: memref<8x16xf32, #tpu.memory_space<vmem>>, %arg10: memref<64x128xf32, #tpu.memory_space<vmem>>, %arg11: memref<64x32xf32, #tpu.memory_space<vmem>>, %arg12: memref<8x32xf32, #tpu.memory_space<vmem>>, %arg13: memref<8x32xf32, #tpu.memory_space<vmem>>) attributes {dimension_semantics = [], scalar_prefetch = 0 : i64, scratch_operands = 4 : i64, tpu.core_type = #tpu.core_type<tc>} {
    %c0 = arith.constant 0 : index
    %c0_0 = arith.constant 0 : index
    %0 = vector.load %arg0[%c0, %c0_0] : memref<64x16xf32, #tpu.memory_space<vmem>>, vector<64x16xf32>
    %c0_1 = arith.constant 0 : index
    %c0_2 = arith.constant 0 : index
    %1 = vector.load %arg1[%c0_1, %c0_2] : memref<16x128xf32, #tpu.memory_space<vmem>>, vector<16x128xf32>
    %cst = arith.constant dense<0.000000e+00> : vector<64x128xf32>
    %2 = tpu.matmul %0, %1, %cst {dimension_numbers = #tpu.dot_dimension_numbers<[1], [0], [0], [1], [0, 0, 1, 1], [], []>} : vector<64x16xf32>, vector<16x128xf32>, vector<64x128xf32> -> vector<64x128xf32>
    %c0_3 = arith.constant 0 : index
    %c0_4 = arith.constant 0 : index
    %3 = vector.load %arg3[%c0_3, %c0_4] : memref<1x128xf32, #tpu.memory_space<vmem>>, vector<1x128xf32>
    %4 = vector.broadcast %3 : vector<1x128xf32> to vector<64x128xf32>
    %5 = arith.addf %2, %4 : vector<64x128xf32>
    %c0_5 = arith.constant 0 : index
    %c0_6 = arith.constant 0 : index
    %6 = vector.load %arg10[%c0_5, %c0_6] : memref<64x128xf32, #tpu.memory_space<vmem>>, vector<64x128xf32>
    tpu.vector_store %arg10[%c0_5, %c0_6], %5 {strides = array<i32>} : memref<64x128xf32, #tpu.memory_space<vmem>>, vector<64x128xf32>,
    %cst_7 = arith.constant 0.000000e+00 : f32
    %7 = vector.broadcast %cst_7 : f32 to vector<8x32xf32>
    %c0_8 = arith.constant 0 : index
    %c0_9 = arith.constant 0 : index
    %8 = vector.load %arg12[%c0_8, %c0_9] : memref<8x32xf32, #tpu.memory_space<vmem>>, vector<8x32xf32>
    tpu.vector_store %arg12[%c0_8, %c0_9], %7 {strides = array<i32>} : memref<8x32xf32, #tpu.memory_space<vmem>>, vector<8x32xf32>,
    %cst_10 = arith.constant 0.000000e+00 : f32
    %9 = vector.broadcast %cst_10 : f32 to vector<8x32xf32>
    %c0_11 = arith.constant 0 : index
    %c0_12 = arith.constant 0 : index
    %10 = vector.load %arg13[%c0_11, %c0_12] : memref<8x32xf32, #tpu.memory_space<vmem>>, vector<8x32xf32>
    tpu.vector_store %arg13[%c0_11, %c0_12], %9 {strides = array<i32>} : memref<8x32xf32, #tpu.memory_space<vmem>>, vector<8x32xf32>,
    %c0_13 = arith.constant 0 : index
    %c0_14 = arith.constant 0 : index
    %11 = vector.load %arg2[%c0_13, %c0_14] : memref<32x128xf32, #tpu.memory_space<vmem>>, vector<32x128xf32>
    %c0_i32 = arith.constant 0 : i32
    %c8_i32 = arith.constant 8 : i32
    %12 = arith.addi %c0_i32, %c8_i32 : i32
    %c1_i32 = arith.constant 1 : i32
    scf.for %arg14 = %c0_i32 to %12 step %c1_i32  : i32 {
      %c1_i32_46 = arith.constant 1 : i32
      %33 = arith.muli %arg14, %c1_i32_46 : i32
      %c0_i32_47 = arith.constant 0 : i32
      %34 = arith.addi %c0_i32_47, %33 : i32
      %c8_i32_48 = arith.constant 8 : i32
      %35 = arith.muli %34, %c8_i32_48 : i32
      %36 = tpu.assume_multiple %35, 8 : i32
      %37 = arith.index_cast %36 : i32 to index
      %c0_49 = arith.constant 0 : index
      %38 = vector.load %arg10[%37, %c0_49] : memref<64x128xf32, #tpu.memory_space<vmem>>, vector<8x128xf32>
      %c0_50 = arith.constant 0 : index
      %c0_51 = arith.constant 0 : index
      %39 = vector.load %arg12[%c0_50, %c0_51] : memref<8x32xf32, #tpu.memory_space<vmem>>, vector<8x32xf32>
      %c0_52 = arith.constant 0 : index
      %c0_53 = arith.constant 0 : index
      %40 = vector.load %arg13[%c0_52, %c0_53] : memref<8x32xf32, #tpu.memory_space<vmem>>, vector<8x32xf32>
      %cst_54 = arith.constant dense<0.000000e+00> : vector<8x128xf32>
      %41 = tpu.matmul %39, %11, %cst_54 {dimension_numbers = #tpu.dot_dimension_numbers<[1], [0], [0], [1], [0, 0, 1, 1], [], []>} : vector<8x32xf32>, vector<32x128xf32>, vector<8x128xf32> -> vector<8x128xf32>
      %42 = arith.addf %38, %41 : vector<8x128xf32>
      %43 = vector.extract_strided_slice %42 {offsets = [0, 0], sizes = [8, 32], strides = [1, 1]} : vector<8x128xf32> to vector<8x32xf32>
      %44 = arith.negf %43 : vector<8x32xf32>
      %45 = math.exp %44 : vector<8x32xf32>
      %cst_55 = arith.constant 1.000000e+00 : f32
      %46 = vector.broadcast %cst_55 : f32 to vector<8x32xf32>
      %47 = arith.addf %46, %45 : vector<8x32xf32>
      %48 = arith.divf %46, %47 : vector<8x32xf32>
      %49 = vector.extract_strided_slice %42 {offsets = [0, 32], sizes = [8, 32], strides = [1, 1]} : vector<8x128xf32> to vector<8x32xf32>
      %50 = arith.negf %49 : vector<8x32xf32>
      %51 = math.exp %50 : vector<8x32xf32>
      %cst_56 = arith.constant 1.000000e+00 : f32
      %52 = vector.broadcast %cst_56 : f32 to vector<8x32xf32>
      %53 = arith.addf %52, %51 : vector<8x32xf32>
      %54 = arith.divf %52, %53 : vector<8x32xf32>
      %55 = vector.extract_strided_slice %42 {offsets = [0, 64], sizes = [8, 32], strides = [1, 1]} : vector<8x128xf32> to vector<8x32xf32>
      %56 = math.tanh %55 : vector<8x32xf32>
      %57 = vector.extract_strided_slice %42 {offsets = [0, 96], sizes = [8, 32], strides = [1, 1]} : vector<8x128xf32> to vector<8x32xf32>
      %58 = arith.negf %57 : vector<8x32xf32>
      %59 = math.exp %58 : vector<8x32xf32>
      %cst_57 = arith.constant 1.000000e+00 : f32
      %60 = vector.broadcast %cst_57 : f32 to vector<8x32xf32>
      %61 = arith.addf %60, %59 : vector<8x32xf32>
      %62 = arith.divf %60, %61 : vector<8x32xf32>
      %63 = arith.mulf %54, %40 : vector<8x32xf32>
      %64 = arith.mulf %48, %56 : vector<8x32xf32>
      %65 = arith.addf %63, %64 : vector<8x32xf32>
      %66 = math.tanh %65 : vector<8x32xf32>
      %67 = arith.mulf %62, %66 : vector<8x32xf32>
      %c0_58 = arith.constant 0 : index
      %c0_59 = arith.constant 0 : index
      %68 = vector.load %arg12[%c0_58, %c0_59] : memref<8x32xf32, #tpu.memory_space<vmem>>, vector<8x32xf32>
      tpu.vector_store %arg12[%c0_58, %c0_59], %67 {strides = array<i32>} : memref<8x32xf32, #tpu.memory_space<vmem>>, vector<8x32xf32>,
      %c0_60 = arith.constant 0 : index
      %c0_61 = arith.constant 0 : index
      %69 = vector.load %arg13[%c0_60, %c0_61] : memref<8x32xf32, #tpu.memory_space<vmem>>, vector<8x32xf32>
      tpu.vector_store %arg13[%c0_60, %c0_61], %65 {strides = array<i32>} : memref<8x32xf32, #tpu.memory_space<vmem>>, vector<8x32xf32>,
      %70 = arith.index_cast %36 : i32 to index
      %c0_62 = arith.constant 0 : index
      %71 = vector.load %arg11[%70, %c0_62] : memref<64x32xf32, #tpu.memory_space<vmem>>, vector<8x32xf32>
      tpu.vector_store %arg11[%70, %c0_62], %67 {strides = array<i32>} : memref<64x32xf32, #tpu.memory_space<vmem>>, vector<8x32xf32>,
    }
    %c8_i32_15 = arith.constant 8 : i32
    %c0_16 = arith.constant 0 : index
    %c0_17 = arith.constant 0 : index
    %13 = vector.load %arg11[%c0_16, %c0_17] : memref<64x32xf32, #tpu.memory_space<vmem>>, vector<64x32xf32>
    %c0_18 = arith.constant 0 : index
    %c0_19 = arith.constant 0 : index
    %14 = vector.load %arg4[%c0_18, %c0_19] : memref<32x128xf32, #tpu.memory_space<vmem>>, vector<32x128xf32>
    %cst_20 = arith.constant dense<0.000000e+00> : vector<64x128xf32>
    %15 = tpu.matmul %13, %14, %cst_20 {dimension_numbers = #tpu.dot_dimension_numbers<[1], [0], [0], [1], [0, 0, 1, 1], [], []>} : vector<64x32xf32>, vector<32x128xf32>, vector<64x128xf32> -> vector<64x128xf32>
    %c0_21 = arith.constant 0 : index
    %c0_22 = arith.constant 0 : index
    %16 = vector.load %arg6[%c0_21, %c0_22] : memref<1x128xf32, #tpu.memory_space<vmem>>, vector<1x128xf32>
    %17 = vector.broadcast %16 : vector<1x128xf32> to vector<64x128xf32>
    %18 = arith.addf %15, %17 : vector<64x128xf32>
    %c0_23 = arith.constant 0 : index
    %c0_24 = arith.constant 0 : index
    %19 = vector.load %arg10[%c0_23, %c0_24] : memref<64x128xf32, #tpu.memory_space<vmem>>, vector<64x128xf32>
    tpu.vector_store %arg10[%c0_23, %c0_24], %18 {strides = array<i32>} : memref<64x128xf32, #tpu.memory_space<vmem>>, vector<64x128xf32>,
    %cst_25 = arith.constant 0.000000e+00 : f32
    %20 = vector.broadcast %cst_25 : f32 to vector<8x32xf32>
    %c0_26 = arith.constant 0 : index
    %c0_27 = arith.constant 0 : index
    %21 = vector.load %arg12[%c0_26, %c0_27] : memref<8x32xf32, #tpu.memory_space<vmem>>, vector<8x32xf32>
    tpu.vector_store %arg12[%c0_26, %c0_27], %20 {strides = array<i32>} : memref<8x32xf32, #tpu.memory_space<vmem>>, vector<8x32xf32>,
    %cst_28 = arith.constant 0.000000e+00 : f32
    %22 = vector.broadcast %cst_28 : f32 to vector<8x32xf32>
    %c0_29 = arith.constant 0 : index
    %c0_30 = arith.constant 0 : index
    %23 = vector.load %arg13[%c0_29, %c0_30] : memref<8x32xf32, #tpu.memory_space<vmem>>, vector<8x32xf32>
    tpu.vector_store %arg13[%c0_29, %c0_30], %22 {strides = array<i32>} : memref<8x32xf32, #tpu.memory_space<vmem>>, vector<8x32xf32>,
    %c0_31 = arith.constant 0 : index
    %c0_32 = arith.constant 0 : index
    %24 = vector.load %arg5[%c0_31, %c0_32] : memref<32x128xf32, #tpu.memory_space<vmem>>, vector<32x128xf32>
    %c0_i32_33 = arith.constant 0 : i32
    %c8_i32_34 = arith.constant 8 : i32
    %25 = arith.addi %c0_i32_33, %c8_i32_34 : i32
    %c1_i32_35 = arith.constant 1 : i32
    scf.for %arg14 = %c0_i32_33 to %25 step %c1_i32_35  : i32 {
      %c1_i32_46 = arith.constant 1 : i32
      %33 = arith.muli %arg14, %c1_i32_46 : i32
      %c0_i32_47 = arith.constant 0 : i32
      %34 = arith.addi %c0_i32_47, %33 : i32
      %c8_i32_48 = arith.constant 8 : i32
      %35 = arith.muli %34, %c8_i32_48 : i32
      %36 = tpu.assume_multiple %35, 8 : i32
      %37 = arith.index_cast %36 : i32 to index
      %c0_49 = arith.constant 0 : index
      %38 = vector.load %arg10[%37, %c0_49] : memref<64x128xf32, #tpu.memory_space<vmem>>, vector<8x128xf32>
      %c0_50 = arith.constant 0 : index
      %c0_51 = arith.constant 0 : index
      %39 = vector.load %arg12[%c0_50, %c0_51] : memref<8x32xf32, #tpu.memory_space<vmem>>, vector<8x32xf32>
      %c0_52 = arith.constant 0 : index
      %c0_53 = arith.constant 0 : index
      %40 = vector.load %arg13[%c0_52, %c0_53] : memref<8x32xf32, #tpu.memory_space<vmem>>, vector<8x32xf32>
      %cst_54 = arith.constant dense<0.000000e+00> : vector<8x128xf32>
      %41 = tpu.matmul %39, %24, %cst_54 {dimension_numbers = #tpu.dot_dimension_numbers<[1], [0], [0], [1], [0, 0, 1, 1], [], []>} : vector<8x32xf32>, vector<32x128xf32>, vector<8x128xf32> -> vector<8x128xf32>
      %42 = arith.addf %38, %41 : vector<8x128xf32>
      %43 = vector.extract_strided_slice %42 {offsets = [0, 0], sizes = [8, 32], strides = [1, 1]} : vector<8x128xf32> to vector<8x32xf32>
      %44 = arith.negf %43 : vector<8x32xf32>
      %45 = math.exp %44 : vector<8x32xf32>
      %cst_55 = arith.constant 1.000000e+00 : f32
      %46 = vector.broadcast %cst_55 : f32 to vector<8x32xf32>
      %47 = arith.addf %46, %45 : vector<8x32xf32>
      %48 = arith.divf %46, %47 : vector<8x32xf32>
      %49 = vector.extract_strided_slice %42 {offsets = [0, 32], sizes = [8, 32], strides = [1, 1]} : vector<8x128xf32> to vector<8x32xf32>
      %50 = arith.negf %49 : vector<8x32xf32>
      %51 = math.exp %50 : vector<8x32xf32>
      %cst_56 = arith.constant 1.000000e+00 : f32
      %52 = vector.broadcast %cst_56 : f32 to vector<8x32xf32>
      %53 = arith.addf %52, %51 : vector<8x32xf32>
      %54 = arith.divf %52, %53 : vector<8x32xf32>
      %55 = vector.extract_strided_slice %42 {offsets = [0, 64], sizes = [8, 32], strides = [1, 1]} : vector<8x128xf32> to vector<8x32xf32>
      %56 = math.tanh %55 : vector<8x32xf32>
      %57 = vector.extract_strided_slice %42 {offsets = [0, 96], sizes = [8, 32], strides = [1, 1]} : vector<8x128xf32> to vector<8x32xf32>
      %58 = arith.negf %57 : vector<8x32xf32>
      %59 = math.exp %58 : vector<8x32xf32>
      %cst_57 = arith.constant 1.000000e+00 : f32
      %60 = vector.broadcast %cst_57 : f32 to vector<8x32xf32>
      %61 = arith.addf %60, %59 : vector<8x32xf32>
      %62 = arith.divf %60, %61 : vector<8x32xf32>
      %63 = arith.mulf %54, %40 : vector<8x32xf32>
      %64 = arith.mulf %48, %56 : vector<8x32xf32>
      %65 = arith.addf %63, %64 : vector<8x32xf32>
      %66 = math.tanh %65 : vector<8x32xf32>
      %67 = arith.mulf %62, %66 : vector<8x32xf32>
      %c0_58 = arith.constant 0 : index
      %c0_59 = arith.constant 0 : index
      %68 = vector.load %arg12[%c0_58, %c0_59] : memref<8x32xf32, #tpu.memory_space<vmem>>, vector<8x32xf32>
      tpu.vector_store %arg12[%c0_58, %c0_59], %67 {strides = array<i32>} : memref<8x32xf32, #tpu.memory_space<vmem>>, vector<8x32xf32>,
      %c0_60 = arith.constant 0 : index
      %c0_61 = arith.constant 0 : index
      %69 = vector.load %arg13[%c0_60, %c0_61] : memref<8x32xf32, #tpu.memory_space<vmem>>, vector<8x32xf32>
      tpu.vector_store %arg13[%c0_60, %c0_61], %65 {strides = array<i32>} : memref<8x32xf32, #tpu.memory_space<vmem>>, vector<8x32xf32>,
    }
    %c8_i32_36 = arith.constant 8 : i32
    %c0_37 = arith.constant 0 : index
    %c0_38 = arith.constant 0 : index
    %26 = vector.load %arg12[%c0_37, %c0_38] : memref<8x32xf32, #tpu.memory_space<vmem>>, vector<8x32xf32>
    %c0_39 = arith.constant 0 : index
    %c0_40 = arith.constant 0 : index
    %27 = vector.load %arg7[%c0_39, %c0_40] : memref<32x16xf32, #tpu.memory_space<vmem>>, vector<32x16xf32>
    %cst_41 = arith.constant dense<0.000000e+00> : vector<8x16xf32>
    %28 = tpu.matmul %26, %27, %cst_41 {dimension_numbers = #tpu.dot_dimension_numbers<[1], [0], [0], [1], [0, 0, 1, 1], [], []>} : vector<8x32xf32>, vector<32x16xf32>, vector<8x16xf32> -> vector<8x16xf32>
    %c0_42 = arith.constant 0 : index
    %c0_43 = arith.constant 0 : index
    %29 = vector.load %arg8[%c0_42, %c0_43] : memref<1x16xf32, #tpu.memory_space<vmem>>, vector<1x16xf32>
    %30 = vector.broadcast %29 : vector<1x16xf32> to vector<8x16xf32>
    %31 = arith.addf %28, %30 : vector<8x16xf32>
    %c0_44 = arith.constant 0 : index
    %c0_45 = arith.constant 0 : index
    %32 = vector.load %arg9[%c0_44, %c0_45] : memref<8x16xf32, #tpu.memory_space<vmem>>, vector<8x16xf32>
    tpu.vector_store %arg9[%c0_44, %c0_45], %31 {strides = array<i32>} : memref<8x16xf32, #tpu.memory_space<vmem>>, vector<8x16xf32>,
    return
  }
}

</mosaic_0001>

<bundles_post_ra>
// kernel: tpu_custom_call.1
= control target key start
LH: loop header
LB: loop body
LE: loop exit
PB: predicated region body
PF: predicated region fallthrough
CT: control target
= control target key end

     0   :  { %14 = vsyncpa [#allocation7], 0  ;;  %vm50_vm0 = vcmask 130048   ;;  %vm188_vm1 = vcmask 261120   ;;  %v977_v11 = vmov 0.0   ;;  %s1222_s0 = inlined_call_operand.vmem [shape: f32[64,16], index: 0, kind: input, shape index: {}]   ;;  %s1223_s1 = inlined_call_operand.vmem [shape: f32[16,128], index: 1, kind: input, shape index: {}]   ;;  %s1224_s2 = inlined_call_operand.vmem [shape: f32[32,128], index: 2, kind: input, shape index: {}]   ;;  %s1225_s3 = inlined_call_operand.vmem [shape: f32[1,128], index: 3, kind: input, shape index: {}]   ;;  %s1226_s4 = inlined_call_operand.vmem [shape: f32[32,128], index: 4, kind: input, shape index: {}]   ;;  %s1227_s5 = inlined_call_operand.vmem [shape: f32[32,128], index: 5, kind: input, shape index: {}]   ;;  %s1228_s6 = inlined_call_operand.vmem [shape: f32[1,128], index: 6, kind: input, shape index: {}]   ;;  %s1229_s7 = inlined_call_operand.vmem [shape: f32[32,16], index: 7, kind: input, shape index: {}]   ;;  %s1230_s8 = inlined_call_operand.vmem [shape: f32[1,16], index: 8, kind: input, shape index: {}]   ;;  %s1231_s9 = inlined_call_operand.hbm [shape: f32[8,16], index: 9, kind: output, shape index: {}]  }
   0x1   :  { %v41_v0 = vld [vmem:[%s1223_s1] sm:$0xff]  ;;  %v42_v1 = vld [vmem:[%s1223_s1 + $0x8] sm:$0xff]  ;;  %v35_v7 = vld [vmem:[%s1222_s0 + $0x10] sm:$0xff]  ;;  %189 = vst.msk [vmem:[#allocation4] sm:$0xff] %vm188_vm1, %v977_v11 }
   0x2   :  { %v853_v2 = vpack.c.bf16 %v42_v1, %v41_v0  ;;  %v33_v3 = vld [vmem:[%s1222_s0] sm:$0xff]  ;;  %v34_v5 = vld [vmem:[%s1222_s0 + $0x8] sm:$0xff]  ;;  %v39_v8 = vld [vmem:[%s1222_s0 + $0x30] sm:$0xff]  ;;  %190 = vst.msk [vmem:[#allocation5] sm:$0xff] %vm188_vm1, %v977_v11 }
   0x3   :  { %v37_v4 = vld [vmem:[%s1222_s0 + $0x20] sm:$0xff]  ;;  %788 = vmatprep.mubr.msk.f32.mxu0 %vm50_vm0, %v33_v3  ;;  %v38_v6 = vld [vmem:[%s1222_s0 + $0x28] sm:$0xff]  ;;  %v36_v9 = vld [vmem:[%s1222_s0 + $0x18] sm:$0xff] }
   0x4   :  { %794 = vmatprep.mubr.msk.f32.mxu1 %vm50_vm0, %v37_v4  ;;  %854 = vmatprep.subr.bf16.mxu0 %v853_v2  ;;  %v40_v10 = vld [vmem:[%s1222_s0 + $0x38] sm:$0xff]  ;;  %v1088_v12 = vld [vmem:[%s1224_s2] sm:$0xff]  ;;  %v1093_v13 = vld [vmem:[%s1224_s2 + $0x8] sm:$0xff] }
   0x5   :  { %883 = vmatprep.subr.bf16.mxu1 %v853_v2  ;;  %856 = vmatpush3.bf16.msra.mxu0 %v853_v2  ;;  %v1098_v14 = vld [vmem:[%s1224_s2 + $0x10] sm:$0xff]  ;;  %v1103_v15 = vld [vmem:[%s1224_s2 + $0x18] sm:$0xff]  ;;  %v721_v16 = vld [vmem:[%s1225_s3] ss:$0 sm:$0xff]  ;;  %s1108_s2 = smov 0  }
   0x6   :  { %884 = vmatpush3.bf16.msra.mxu1 %v853_v2 }
   0x8   :  { %789 = vmatmul.mubr.msk.f32.vlgmr.msra.gmra.mrb[0].mxu0 %vm50_vm0, %v34_v5 }
   0x9   :  { %795 = vmatmul.mubr.msk.f32.vlgmr.msra.gmra.mrb[0].mxu1 %vm50_vm0, %v38_v6  ;;  %791 = vmatprep.mubr.msk.f32.mxu0 %vm50_vm0, %v35_v7 }
   0xa   :  { %797 = vmatprep.mubr.msk.f32.mxu1 %vm50_vm0, %v39_v8 }
   0xc   :  { %792 = vmatmul.mubr.msk.f32.gmra.mrb[2].mxu0 %vm50_vm0, %v36_v9 }
   0xd   :  { %798 = vmatmul.mubr.msk.f32.gmra.mrb[2].mxu1 %vm50_vm0, %v40_v10 }
  0xdb   :  { %v790_v17 = vpop.f32.mrb[0].mxu0 }
  0xdc   :  { %v796_v18 = vpop.f32.mrb[0].mxu1  ;;  %v147_v19 = vadd.f32 %v790_v17, %v721_v16  ;;  %v141_v21 = vpop.f32.mrb[1].mxu0 }
  0xdd   :  { %v167_v20 = vadd.f32 %v796_v18, %v721_v16  ;;  %v161_v22 = vpop.f32.mrb[1].mxu1  ;;  %v142_v23 = vadd.f32 %v721_v16, %v141_v21 }
  0xde   :  { %v162_v24 = vadd.f32 %v721_v16, %v161_v22  ;;  %181 = vst [vmem:[#allocation2 + $0x8] sm:$0xff] %v147_v19 }
  0xdf   :  { %185 = vst [vmem:[#allocation2 + $0x28] sm:$0xff] %v167_v20  ;;  %180 = vst [vmem:[#allocation2] sm:$0xff] %v142_v23  ;;  %v793_v25 = vpop.f32.mrb[2].mxu0 }
  0xe0   :  { %184 = vst [vmem:[#allocation2 + $0x20] sm:$0xff] %v162_v24  ;;  %v799_v26 = vpop.f32.mrb[2].mxu1  ;;  %v157_v27 = vadd.f32 %v793_v25, %v721_v16  ;;  %v151_v29 = vpop.f32.mrb[3].mxu0 }
  0xe1   :  { %v177_v28 = vadd.f32 %v799_v26, %v721_v16  ;;  %v171_v30 = vpop.f32.mrb[3].mxu1  ;;  %v152_v31 = vadd.f32 %v721_v16, %v151_v29 }
  0xe2   :  { %v172_v32 = vadd.f32 %v721_v16, %v171_v30  ;;  %183 = vst [vmem:[#allocation2 + $0x18] sm:$0xff] %v157_v27 }
  0xe3   :  { %187 = vst [vmem:[#allocation2 + $0x38] sm:$0xff] %v177_v28  ;;  %182 = vst [vmem:[#allocation2 + $0x10] sm:$0xff] %v152_v31 }
  0xe4   :  { %186 = vst [vmem:[#allocation2 + $0x30] sm:$0xff] %v172_v32 }
  0xe5 LB: > { %v858_v33 = vpack.c.bf16 %v1093_v13, %v1088_v12  ;;  %v978_v34 = vmov 0.0|0.0   ;;  %v861_v35 = vpack.c.bf16 %v1103_v15, %v1098_v14  ;;  %vm979_vm2 = vmmov 0   ;;  %v204_v37 = vld [vmem:[#allocation4] sm:$0xff]  ;;  %s730_s3 = sshll.u32 %s971_s2, 3  ;;  %s981_s17 = smov 64   ;;  %v205_v43 = vld [vmem:[#allocation5] sm:$0xff]  ;;  %s971_s2 = sphi %s1108_s2, %s200_s2  }
  0xe6   : > { %857 = vmatprep.subr.bf16.mxu0 %v978_v34  ;;  %v980_v36 = vmov 0.0   ;;  %s202_s16 = scalar_lea.vmem [#allocation2], %s730_s3  ;;  %s982_s1 = smov 32  }
  0xe7   : > { %859 = vmatpush3.bf16.msra.mxu0 %v858_v33  ;;  %808 = vmatprep.mubr.msk.f32.mxu0 %vm979_vm2, %v980_v36  ;;  %s983_s18 = smov 96   ;;  %s318_s19 = scalar_lea.vmem [#allocation3], %s730_s3 }
  0xe8   : > { %860 = vmatprep.subr.bf16.mxu0 %v978_v34  ;;  %s200_s2 = sadd.s32 1, %s971_s2  }
  0xe9   : > { %p197_p0 = scmp.ge.s32.totalorder %s200_s2, 8  }
  0xea   :  { %v328_v59 = vld [vmem:[%s1226_s4] sm:$0xff] (%p197_p0)  ;;  %v329_v60 = vld [vmem:[%s1226_s4 + $0x8] sm:$0xff] (%p197_p0)  ;;  %v330_v61 = vld [vmem:[%s1226_s4 + $0x10] sm:$0xff] (%p197_p0) }
  0xeb   : > { %862 = vmatpush3.bf16.msra.mxu0 %v861_v35  ;;  %v203_v38 = vld [vmem:[%s202_s16] sm:$0xff]  ;;  %v863_v62 = vpack.c.bf16 (%p197_p0), %v329_v60, %v328_v59  ;;  %v331_v63 = vld [vmem:[%s1226_s4 + $0x18] sm:$0xff] (%p197_p0)  ;;  %v1161_v10 = vld [vmem:[%s1227_s5 + $0x8] sm:$0xff] (%p197_p0) }
  0xec   :  { %v867_v2 = vpack.c.bf16 (%p197_p0), %v331_v63, %v330_v61  ;;  %v1156_v9 = vld [vmem:[%s1227_s5] sm:$0xff] (%p197_p0)  ;;  %v1166_v12 = vld [vmem:[%s1227_s5 + $0x10] sm:$0xff] (%p197_p0)  ;;  %v1171_v13 = vld [vmem:[%s1227_s5 + $0x18] sm:$0xff] (%p197_p0)  ;;  %s1176_s5 = smov (%p197_p0), 0  }
  0xed   :  { %864 = vmatprep.subr.bf16.mxu0 (%p197_p0), %v863_v62  ;;  %885 = vmatprep.subr.bf16.mxu1 (%p197_p0), %v863_v62  ;;  %v733_v14 = vld [vmem:[%s1228_s6] ss:$0 sm:$0xff] (%p197_p0) }
  0xee   : > { %809 = vmatmul.mubr.msk.f32.vlgmr.msra.gmra.mrb[0].mxu0 %vm188_vm1, %v204_v37  ;;  %887 = vmatpush3.bf16.msra.mxu1 (%p197_p0), %v863_v62 }
  0xef   :  { %866 = vmatpush3.bf16.msra.mxu0 (%p197_p0), %v863_v62  ;;  %886 = vmatprep.subr.bf16.mxu1 (%p197_p0), %v867_v2 }
  0xf0   :  { %868 = vmatprep.subr.bf16.mxu0 (%p197_p0), %v867_v2 }
  0xf2   :  { %888 = vmatpush3.bf16.msra.mxu1 (%p197_p0), %v867_v2 }
  0xf3   :  { %870 = vmatpush3.bf16.msra.mxu0 (%p197_p0), %v867_v2 }
 0x1c1   : > { %v275_v39 = vpop.f32.mrb[0].mxu0 }
 0x1c2   : > { %v279_v40 = vadd.f32 %v275_v39, %v203_v38  ;;  %v810_v41 = vpop.f32.mrb[1].mxu0 }
 0x1c4   : > { %921 = vtanh.f32 %v279_v40  ;;  %v732_v44 = vmul.f32 -1.442695, %v279_v40 }
 0x1c6   : > { %923 = vpow2.f32 %v732_v44 }
 0x1ce   : > { %v922_v42 = vpop.eup %921 }
 0x1cf   : > { %293 = vrot.lane.b32.xlu0 %v922_v42, %s981_s17 }
 0x1d0   : > { %v924_v45 = vpop.eup %923 }
 0x1d1   : > { %v283_v46 = vadd.f32 1.0, %v924_v45 }
 0x1d3   : > { %288 = vrot.lane.b32.xlu0 %v205_v43, %s982_s1  ;;  %925 = vrcp.f32 %v283_v46 }
 0x1dd   : > { %v926_v47 = vpop.eup %925 }
 0x241   : > { %v294_v48 = vpop.permute.xlu0 %293 }
 0x242   : > { %v296_v49 = vmul.f32 %v926_v47, %v294_v48 }
 0x244   : > { %298 = vrot.lane.b32.xlu1 %v296_v49, %s982_s1 }
 0x245   : > { %v289_v50 = vpop.permute.xlu0 %288 }
 0x246   : > { %v291_v51 = vmul.f32 %v926_v47, %v289_v50 }
 0x2b6   : > { %v299_v52 = vpop.permute.xlu1 %298 }
 0x2b7   : > { %v301_v53 = vadd.f32 %v299_v52, %v291_v51 }
 0x2b9   : > { %927 = vtanh.f32 %v301_v53 }
 0x2c3   : > { %v928_v54 = vpop.eup %927 }
 0x2c4   : > { %304 = vrot.lane.b32.xlu1 %v928_v54, %s981_s17 }
 0x2c8   : > { %314 = vrot.lane.b32.xlu1 %v301_v53, %s983_s18 }
 0x336   : > { %v305_v55 = vpop.permute.xlu1 %304 }
 0x337   : > { %v307_v56 = vmul.f32 %v926_v47, %v305_v55 }
 0x339   : > { %309 = vrot.lane.b32.xlu0 %v307_v56, %s982_s1 }
 0x33a   : > { %v315_v57 = vpop.permute.xlu1 %314 }
 0x33b   : > { %317 = vst.msk [vmem:[#allocation5] sm:$0xff] %vm188_vm1, %v315_v57 }
 0x33c   :  { %477 = vst.msk [vmem:[#allocation5] sm:$0xff] (%p197_p0), %vm188_vm1, %v977_v11 }
 0x3a6   :  { %199 = sbr.rel (!%p197_p0) target bundleno = 229 (0xe5), region = 73 }
 0x3ab   : > { %v310_v58 = vpop.permute.xlu0 %309 }
 0x3ac   : > { %312 = vst.msk [vmem:[#allocation4] sm:$0xff] %vm188_vm1, %v310_v58  ;;  %319 = vst.msk [vmem:[%s318_s19] sm:$0xff] %vm188_vm1, %v310_v58 }
 0x3ad   :  { %476 = vst.msk [vmem:[#allocation4] sm:$0xff] %vm188_vm1, %v977_v11 }
 0x3b3   :  { %v320_v0 = vld [vmem:[#allocation3] sm:$0xff]  ;;  %v321_v3 = vld [vmem:[#allocation3 + $0x8] sm:$0xff]  ;;  %v322_v5 = vld [vmem:[#allocation3 + $0x10] sm:$0xff] }
 0x3b4   :  { %v324_v1 = vld [vmem:[#allocation3 + $0x20] sm:$0xff]  ;;  %819 = vmatprep.mubr.msk.f32.mxu0 %vm188_vm1, %v320_v0  ;;  %v325_v4 = vld [vmem:[#allocation3 + $0x28] sm:$0xff]  ;;  %v326_v6 = vld [vmem:[#allocation3 + $0x30] sm:$0xff] }
 0x3b5   :  { %825 = vmatprep.mubr.msk.f32.mxu1 %vm188_vm1, %v324_v1  ;;  %820 = vmatmul.mubr.msk.f32.vlgmr.msra.gmra.mrb[0].mxu0 %vm188_vm1, %v321_v3  ;;  %v323_v7 = vld [vmem:[#allocation3 + $0x18] sm:$0xff] }
 0x3b6   :  { %826 = vmatmul.mubr.msk.f32.vlgmr.msra.gmra.mrb[0].mxu1 %vm188_vm1, %v325_v4  ;;  %822 = vmatprep.mubr.msk.f32.mxu0 %vm188_vm1, %v322_v5  ;;  %v327_v8 = vld [vmem:[#allocation3 + $0x38] sm:$0xff] }
 0x3b7   :  { %828 = vmatprep.mubr.msk.f32.mxu1 %vm188_vm1, %v326_v6 }
 0x3b9   :  { %823 = vmatmul.mubr.msk.f32.gmra.mrb[2].mxu0 %vm188_vm1, %v323_v7 }
 0x3ba   :  { %829 = vmatmul.mubr.msk.f32.gmra.mrb[2].mxu1 %vm188_vm1, %v327_v8 }
 0x488   :  { %v821_v15 = vpop.f32.mrb[0].mxu0 }
 0x489   :  { %v827_v16 = vpop.f32.mrb[0].mxu1  ;;  %v435_v17 = vadd.f32 %v821_v15, %v733_v14  ;;  %v429_v19 = vpop.f32.mrb[1].mxu0 }
 0x48a   :  { %v455_v18 = vadd.f32 %v827_v16, %v733_v14  ;;  %v449_v20 = vpop.f32.mrb[1].mxu1  ;;  %v430_v21 = vadd.f32 %v733_v14, %v429_v19 }
 0x48b   :  { %v450_v22 = vadd.f32 %v733_v14, %v449_v20  ;;  %469 = vst [vmem:[#allocation2 + $0x8] sm:$0xff] %v435_v17 }
 0x48c   :  { %473 = vst [vmem:[#allocation2 + $0x28] sm:$0xff] %v455_v18  ;;  %468 = vst [vmem:[#allocation2] sm:$0xff] %v430_v21  ;;  %v824_v23 = vpop.f32.mrb[2].mxu0 }
 0x48d   :  { %472 = vst [vmem:[#allocation2 + $0x20] sm:$0xff] %v450_v22  ;;  %v830_v24 = vpop.f32.mrb[2].mxu1  ;;  %v445_v25 = vadd.f32 %v824_v23, %v733_v14  ;;  %v439_v27 = vpop.f32.mrb[3].mxu0 }
 0x48e   :  { %v465_v26 = vadd.f32 %v830_v24, %v733_v14  ;;  %v459_v28 = vpop.f32.mrb[3].mxu1  ;;  %v440_v29 = vadd.f32 %v733_v14, %v439_v27 }
 0x48f   :  { %v460_v30 = vadd.f32 %v733_v14, %v459_v28  ;;  %471 = vst [vmem:[#allocation2 + $0x18] sm:$0xff] %v445_v25 }
 0x490   :  { %475 = vst [vmem:[#allocation2 + $0x38] sm:$0xff] %v465_v26  ;;  %470 = vst [vmem:[#allocation2 + $0x10] sm:$0xff] %v440_v29 }
 0x491   :  { %474 = vst [vmem:[#allocation2 + $0x30] sm:$0xff] %v460_v30 }
 0x492 LB: > { %v872_v31 = vpack.c.bf16 %v1161_v10, %v1156_v9  ;;  %v984_v32 = vmov 0.0|0.0   ;;  %v875_v33 = vpack.c.bf16 %v1171_v13, %v1166_v12  ;;  %vm985_vm3 = vmmov 0   ;;  %v491_v35 = vld [vmem:[#allocation4] sm:$0xff]  ;;  %s742_s6 = sshll.u32 %s975_s5, 3  ;;  %s987_s2 = smov 64   ;;  %v492_v41 = vld [vmem:[#allocation5] sm:$0xff]  ;;  %s975_s5 = sphi %s1176_s5, %s487_s5  }
 0x493   : > { %871 = vmatprep.subr.bf16.mxu0 %v984_v32  ;;  %v986_v34 = vmov 0.0   ;;  %s489_s15 = scalar_lea.vmem [#allocation2], %s742_s6  ;;  %s988_s3 = smov 32  }
 0x494   : > { %873 = vmatpush3.bf16.msra.mxu0 %v872_v31  ;;  %839 = vmatprep.mubr.msk.f32.mxu0 %vm985_vm3, %v986_v34  ;;  %s989_s16 = smov 96   ;;  %s487_s5 = sadd.s32 1, %s975_s5  }
 0x495   : > { %874 = vmatprep.subr.bf16.mxu0 %v984_v32  ;;  %p484_p1 = scmp.ge.s32.totalorder %s487_s5, 8  }
 0x496   :  { %v606_v57 = vld [vmem:[%s1229_s7] sm:$0xff] (%p484_p1)  ;;  %v607_v58 = vld [vmem:[%s1229_s7 + $0x8] sm:$0xff] (%p484_p1)  ;;  %v608_v59 = vld [vmem:[%s1229_s7 + $0x10] sm:$0xff] (%p484_p1)  ;;  %v990_v60 = vmov (%p484_p1), 0.0|0.0   ;;  %vm991_vm4 = vmmov (%p484_p1), 0   ;;  %s992_s26 = smov (%p484_p1), [#allocation6]  }
 0x497   :  { %v878_v61 = vpack.c.bf16 (%p484_p1), %v607_v58, %v606_v57  ;;  %v609_v62 = vld [vmem:[%s1229_s7 + $0x18] sm:$0xff] (%p484_p1)  ;;  %v745_v1 = vld [vmem:[%s1230_s8] ss:$0 sm:$0xff] (%p484_p1)  ;;  %s697_s27 = sshll.u32 (%p484_p1), %s992_s26, 4  ;;  %s698_s27 = int_to_ptr.vmem [resolvable:$true] %s697_s27 }
 0x498   : > { %876 = vmatpush3.bf16.msra.mxu0 %v875_v33  ;;  %v490_v36 = vld [vmem:[%s489_s15] sm:$0xff]  ;;  %v881_v63 = vpack.c.bf16 (%p484_p1), %v609_v62, %v608_v59  ;;  %s937_s7 = scalar_lea.vmem (%p484_p1), %s698_s27, 128  ;;  %p942_p3 = scmp.lt.s32.totalorder (%p484_p1), %s698_s27, %s698_s27 }
 0x499   :  { %877 = vmatprep.subr.bf16.mxu0 (%p484_p1), %v990_v60  ;;  %p938_p2 = scmp.ne.s32.totalorder (%p484_p1), %s698_s27, %s937_s7  ;;  %p943_p4 = scmp.lt.s32.totalorder (%p484_p1), %s937_s7, %s937_s7 }
 0x49b   : > { %840 = vmatmul.mubr.msk.f32.vlgmr.msra.gmra.mrb[0].mxu0 %vm188_vm1, %v491_v35  ;;  %p944_p5 = por (%p484_p1), %p943_p4, %p942_p3 }
 0x49c   :  { %850 = vmatprep.mubr.msk.f32.mxu0 (%p484_p1), %vm991_vm4, %v977_v11  ;;  %879 = vmatpush3.bf16.msra.mxu0 (%p484_p1), %v878_v61 }
 0x49d   :  { %880 = vmatprep.subr.bf16.mxu0 (%p484_p1), %v990_v60  ;;  %p945_p6 = pnand (%p484_p1), %p944_p5, %p938_p2 }
 0x4a0   :  { %882 = vmatpush3.bf16.msra.mxu0 (%p484_p1), %v881_v63 }
 0x56e   : > { %v562_v37 = vpop.f32.mrb[0].mxu0 }
 0x56f   : > { %v566_v38 = vadd.f32 %v562_v37, %v490_v36  ;;  %v841_v39 = vpop.f32.mrb[1].mxu0 }
 0x571   : > { %929 = vtanh.f32 %v566_v38  ;;  %v744_v42 = vmul.f32 -1.442695, %v566_v38 }
 0x573   : > { %931 = vpow2.f32 %v744_v42 }
 0x57b   : > { %v930_v40 = vpop.eup %929 }
 0x57c   : > { %580 = vrot.lane.b32.xlu0 %v930_v40, %s987_s2 }
 0x57d   : > { %v932_v43 = vpop.eup %931 }
 0x57e   : > { %v570_v44 = vadd.f32 1.0, %v932_v43 }
 0x580   : > { %575 = vrot.lane.b32.xlu0 %v492_v41, %s988_s3  ;;  %933 = vrcp.f32 %v570_v44 }
 0x58a   : > { %v934_v45 = vpop.eup %933 }
 0x5ee   : > { %v581_v46 = vpop.permute.xlu0 %580 }
 0x5ef   : > { %v583_v47 = vmul.f32 %v934_v45, %v581_v46 }
 0x5f1   : > { %585 = vrot.lane.b32.xlu1 %v583_v47, %s988_s3 }
 0x5f2   : > { %v576_v48 = vpop.permute.xlu0 %575 }
 0x5f3   : > { %v578_v49 = vmul.f32 %v934_v45, %v576_v48 }
 0x663   : > { %v586_v50 = vpop.permute.xlu1 %585 }
 0x664   : > { %v588_v51 = vadd.f32 %v586_v50, %v578_v49 }
 0x666   : > { %935 = vtanh.f32 %v588_v51 }
 0x670   : > { %v936_v52 = vpop.eup %935 }
 0x671   : > { %591 = vrot.lane.b32.xlu1 %v936_v52, %s987_s2 }
 0x675   : > { %601 = vrot.lane.b32.xlu1 %v588_v51, %s989_s16 }
 0x6e3   : > { %v592_v53 = vpop.permute.xlu1 %591 }
 0x6e4   : > { %v594_v54 = vmul.f32 %v934_v45, %v592_v53 }
 0x6e6   : > { %596 = vrot.lane.b32.xlu0 %v594_v54, %s988_s3 }
 0x6e7   : > { %v602_v55 = vpop.permute.xlu1 %601 }
 0x6e8   : > { %604 = vst.msk [vmem:[#allocation5] sm:$0xff] %vm188_vm1, %v602_v55 }
 0x753   :  { %486 = sbr.rel (!%p484_p1) target bundleno = 1170 (0x492), region = 84 }
 0x758   : > { %v597_v56 = vpop.permute.xlu0 %596 }
 0x759   : > { %599 = vst.msk [vmem:[#allocation4] sm:$0xff] %vm188_vm1, %v597_v56 }
 0x760   :  { %v605_v0 = vld [vmem:[#allocation4] sm:$0xff] }
 0x761   :  { %851 = vmatmul.mubr.msk.f32.vlgmr.msra.gmra.mrb[0].mxu0 %vm188_vm1, %v605_v0 }
 0x834   :  { %v686_v2 = vpop.f32.mrb[0].mxu0 }
 0x835   :  { %v687_v3 = vadd.f32 %v745_v1, %v686_v2  ;;  %v852_v4 = vpop.f32.mrb[1].mxu0 }
 0x837   :  { %690 = vst.msk [vmem:[#allocation6] sm:$0xff] %vm50_vm0, %v687_v3 }
 0x838   :  { %948 = shalt.err (!%p945_p6)
}
 0x839   :  { %s949_s29 = scalar_lea.hbm %s1231_s9, 128 }
 0x83a   :  { %p950_p7 = scmp.ne.s32.totalorder %s1231_s9, %s949_s29  ;;  %p953_p8 = scmp.lt.u32.totalorder %s949_s29, %s1231_s9 }
 0x83c   :  { %p955_p9 = pnand %p953_p8, %p950_p7 }
 0x83e   :  { %958 = shalt.err (!%p955_p9)
}
 0x83f   :  { %700 = dma.vmem_to_hbm [thread:$0]  %s698_s27, 128, %s1231_s9, [#allocation7]  }
 0x840   :  { %967 = dma.done.wait [#allocation7], 128  }
 0x841   :  { %968 = vsyncadd [#allocation7], 4294967168 }
 0x842   :  { %704 = vsyncpa [#allocation7], 1 }

</bundles_post_ra>
